<compile_context>
chip_gen: v5e
topology: v5e:2x2
jax: 0.10.0
libtpu: 0.0.40
codegen_flags: <defaults>
</compile_context>

<pallas_src>
import math
import functools

import jax
import jax.numpy as jnp
from jax.experimental import pallas as pl
from jax.experimental.pallas import tpu as pltpu

LANE = 128


def _round_up(n, m=LANE):
    return ((n + m - 1) // m) * m


# ----------------------------- fused Pallas kernel -----------------------------

def _fused_mlp_kernel(n_hidden, has_out, *refs):
    """refs = (x_ref, w0, b0, w1, b1, ..., [w_out, b_out], o_ref).

    Computes  h = relu(h @ W'_l + b'_l)  for each hidden layer (BN already folded),
    then the (lane-padded) output Linear. All intermediates stay in vregs/VMEM.
    """
    x_ref = refs[0]
    o_ref = refs[-1]
    prefs = refs[1:-1]

    h = x_ref[...]
    k = 0
    for _ in range(n_hidden):
        w = prefs[k][...]
        b = prefs[k + 1][...]
        k += 2
        h = jnp.dot(h.astype(w.dtype), w, preferred_element_type=jnp.float32) + b
        h = jnp.maximum(h, 0.0)
    if has_out:
        w = prefs[k][...]
        b = prefs[k + 1][...]
        h = jnp.dot(h.astype(w.dtype), w, preferred_element_type=jnp.float32) + b
    o_ref[...] = h.astype(o_ref.dtype)


@functools.partial(
    jax.jit,
    static_argnames=("n_hidden", "has_out", "out_pad", "out_true", "block_b"),
)
def _forward_impl(x, flat, *, n_hidden, has_out, out_pad, out_true, block_b):
    B, D = x.shape
    bb = B if B <= block_b else block_b          # full-batch block if small, else tile
    pad_rows = (-B) % bb
    if pad_rows:
        x = jnp.pad(x, ((0, pad_rows), (0, 0)))
    Bp = B + pad_rows
    grid = (Bp // bb,)

    in_specs = [pl.BlockSpec((bb, D), lambda i: (i, 0))]
    # Weights/biases: constant index_map -> stay VMEM-resident across batch tiles.
    in_specs += [pl.BlockSpec(a.shape, lambda i: (0, 0)) for a in flat]
    out_spec = pl.BlockSpec((bb, out_pad), lambda i: (i, 0))

    kernel = functools.partial(_fused_mlp_kernel, n_hidden, has_out)
    y = pl.pallas_call(
        kernel,
        out_shape=jax.ShapeDtypeStruct((Bp, out_pad), jnp.float32),
        grid=grid,
        in_specs=in_specs,
        out_specs=out_spec,
        compiler_params=pltpu.CompilerParams(dimension_semantics=("parallel",)),
    )(x, *flat)
    # Drop batch padding and the lane padding of the final layer.
    return y[:B, :out_true]


def basic_dnn_forward(x, kparams, block_b=512):
    return _forward_impl(
        x,
        tuple(kparams["flat"]),
        n_hidden=kparams["n_hidden"],
        has_out=kparams["has_out"],
        out_pad=kparams["out_pad_dim"],
        out_true=kparams["out_true_dim"],
        block_b=block_b,
    )


# ----------------------------- parameter init -----------------------------

def init_params(key, input_dim, embed_dims, output_layer=True, bn_eps=1e-5,
                weight_dtype=jnp.float32):
    """Matches PyTorch defaults (Linear.weight: xavier_uniform_, Linear.bias: U(+-1/sqrt(fan_in)),
    BatchNorm1d fresh init). Returns:
      kparams: BN-folded, lane-padded params for the fused kernel.
      ref_params: unfolded/unpadded params for the pure-JAX reference.
    """
    ref_hidden = []
    flat = []
    in_true = input_dim
    in_pad = input_dim            # x itself is not padded; first weight uses true input_dim rows
    for embed_dim in embed_dims:
        key, kw, kb = jax.random.split(key, 3)
        bound_w = math.sqrt(6.0 / (in_true + embed_dim))                 # xavier_uniform_
        w = jax.random.uniform(kw, (in_true, embed_dim), jnp.float32, -bound_w, bound_w)
        bound_b = 1.0 / math.sqrt(in_true)
        b = jax.random.uniform(kb, (1, embed_dim), jnp.float32, -bound_b, bound_b)
        # BatchNorm1d (eval, fresh init): scale = gamma/sqrt(var+eps) = 1/sqrt(1+eps), shift = 0
        scale = jnp.full((1, embed_dim), 1.0 / math.sqrt(1.0 + bn_eps), jnp.float32)
        shift = jnp.zeros((1, embed_dim), jnp.float32)
        ref_hidden.append((w, b, scale, shift))

        # Fold BN into the Linear and zero-pad to a multiple of 128 lanes.
        out_pad = _round_up(embed_dim)
        wf = jnp.zeros((in_pad, out_pad), jnp.float32)
        wf = wf.at[:in_true, :embed_dim].set(w * scale)
        bf = jnp.zeros((1, out_pad), jnp.float32)
        bf = bf.at[:, :embed_dim].set(b * scale + shift)
        flat += [wf.astype(weight_dtype), bf]          # biases stay f32 (tiny)

        in_true = embed_dim
        in_pad = out_pad

    ref_out = None
    if output_layer:
        key, kw, kb = jax.random.split(key, 3)
        bound_w = math.sqrt(6.0 / (in_true + 1))
        w = jax.random.uniform(kw, (in_true, 1), jnp.float32, -bound_w, bound_w)
        bound_b = 1.0 / math.sqrt(in_true)
        b = jax.random.uniform(kb, (1, 1), jnp.float32, -bound_b, bound_b)
        ref_out = (w, b)
        # Lane-dense final output: pad N=1 -> 128 zero columns; real output is column 0.
        out_pad = LANE
        wf = jnp.zeros((in_pad, out_pad), jnp.float32).at[:in_true, :1].set(w)
        bf = jnp.zeros((1, out_pad), jnp.float32).at[:, :1].set(b)
        flat += [wf.astype(weight_dtype), bf]
        out_true = 1
    else:
        out_true = in_true
        out_pad = in_pad

    kparams = dict(flat=tuple(flat), n_hidden=len(embed_dims), has_out=bool(output_layer),
                   out_true_dim=int(out_true), out_pad_dim=int(out_pad))
    ref_params = dict(hidden=ref_hidden, out=ref_out)
    return kparams, ref_params


# ----------------------------- pure-JAX reference -----------------------------

def basic_dnn_reference(x, ref_params):
    h = x
    for (w, b, scale, shift) in ref_params["hidden"]:
        h = jnp.maximum((h @ w + b) * scale + shift, 0.0)
    if ref_params["out"] is not None:
        w, b = ref_params["out"]
        h = h @ w + b
    return h


# ----------------------------- main -----------------------------

if __name__ == "__main__":
    key = jax.random.PRNGKey(0)
    batch, input_dim = 8, 32
    embed_dims = (64, 32)

    key, kx, kp = jax.random.split(key, 3)
    x = jax.random.normal(kx, (batch, input_dim), jnp.float32)
    kparams, ref_params = init_params(kp, input_dim, embed_dims, output_layer=True)

    out = jax.block_until_ready(basic_dnn_forward(x, kparams))
    ref = basic_dnn_reference(x, ref_params)

    assert out.shape == (batch, 1), out.shape
    assert jnp.allclose(out, ref, atol=1e-4, rtol=1e-4), "mismatch vs reference"

    print("KERNEL_OK")
</pallas_src>

<mosaic_0001>
module attributes {stable_mosaic.version = 11 : i64} {
  func.func @_fused_mlp_kernel(%arg0: i32, %arg1: memref<8x32xf32, #tpu.memory_space<vmem>>, %arg2: memref<32x128xf32, #tpu.memory_space<vmem>>, %arg3: memref<1x128xf32, #tpu.memory_space<vmem>>, %arg4: memref<128x128xf32, #tpu.memory_space<vmem>>, %arg5: memref<1x128xf32, #tpu.memory_space<vmem>>, %arg6: memref<128x128xf32, #tpu.memory_space<vmem>>, %arg7: memref<1x128xf32, #tpu.memory_space<vmem>>, %arg8: memref<8x128xf32, #tpu.memory_space<vmem>>) attributes {dimension_semantics = [#tpu.dimension_semantics<parallel>], iteration_bounds = array<i64: 1>, scalar_prefetch = 0 : i64, scratch_operands = 0 : i64, tpu.core_type = #tpu.core_type<tc>, window_params = [{transform_indices = @transform_0, window_bounds = array<i64: 8, 32>}, {pipeline_mode = #tpu.pipeline_mode<synchronous>, transform_indices = @transform_1, window_bounds = array<i64: 32, 128>}, {pipeline_mode = #tpu.pipeline_mode<synchronous>, transform_indices = @transform_2, window_bounds = array<i64: 1, 128>}, {pipeline_mode = #tpu.pipeline_mode<synchronous>, transform_indices = @transform_3, window_bounds = array<i64: 128, 128>}, {pipeline_mode = #tpu.pipeline_mode<synchronous>, transform_indices = @transform_4, window_bounds = array<i64: 1, 128>}, {pipeline_mode = #tpu.pipeline_mode<synchronous>, transform_indices = @transform_5, window_bounds = array<i64: 128, 128>}, {pipeline_mode = #tpu.pipeline_mode<synchronous>, transform_indices = @transform_6, window_bounds = array<i64: 1, 128>}, {transform_indices = @transform_7, window_bounds = array<i64: 8, 128>}]} {
    %c0 = arith.constant 0 : index
    %c0_0 = arith.constant 0 : index
    %0 = vector.load %arg1[%c0, %c0_0] : memref<8x32xf32, #tpu.memory_space<vmem>>, vector<8x32xf32>
    %c0_1 = arith.constant 0 : index
    %c0_2 = arith.constant 0 : index
    %1 = vector.load %arg2[%c0_1, %c0_2] : memref<32x128xf32, #tpu.memory_space<vmem>>, vector<32x128xf32>
    %c0_3 = arith.constant 0 : index
    %c0_4 = arith.constant 0 : index
    %2 = vector.load %arg3[%c0_3, %c0_4] : memref<1x128xf32, #tpu.memory_space<vmem>>, vector<1x128xf32>
    %cst = arith.constant dense<0.000000e+00> : vector<8x128xf32>
    %3 = tpu.matmul %0, %1, %cst {dimension_numbers = #tpu.dot_dimension_numbers<[1], [0], [0], [1], [0, 0, 1, 1], [], []>} : vector<8x32xf32>, vector<32x128xf32>, vector<8x128xf32> -> vector<8x128xf32>
    %4 = vector.broadcast %2 : vector<1x128xf32> to vector<8x128xf32>
    %5 = arith.addf %3, %4 : vector<8x128xf32>
    %cst_5 = arith.constant 0.000000e+00 : f32
    %6 = vector.broadcast %cst_5 : f32 to vector<8x128xf32>
    %7 = arith.maximumf %5, %6 : vector<8x128xf32>
    %c0_6 = arith.constant 0 : index
    %c0_7 = arith.constant 0 : index
    %8 = vector.load %arg4[%c0_6, %c0_7] : memref<128x128xf32, #tpu.memory_space<vmem>>, vector<128x128xf32>
    %c0_8 = arith.constant 0 : index
    %c0_9 = arith.constant 0 : index
    %9 = vector.load %arg5[%c0_8, %c0_9] : memref<1x128xf32, #tpu.memory_space<vmem>>, vector<1x128xf32>
    %cst_10 = arith.constant dense<0.000000e+00> : vector<8x128xf32>
    %10 = tpu.matmul %7, %8, %cst_10 {dimension_numbers = #tpu.dot_dimension_numbers<[1], [0], [0], [1], [0, 0, 1, 1], [], []>} : vector<8x128xf32>, vector<128x128xf32>, vector<8x128xf32> -> vector<8x128xf32>
    %11 = vector.broadcast %9 : vector<1x128xf32> to vector<8x128xf32>
    %12 = arith.addf %10, %11 : vector<8x128xf32>
    %cst_11 = arith.constant 0.000000e+00 : f32
    %13 = vector.broadcast %cst_11 : f32 to vector<8x128xf32>
    %14 = arith.maximumf %12, %13 : vector<8x128xf32>
    %c0_12 = arith.constant 0 : index
    %c0_13 = arith.constant 0 : index
    %15 = vector.load %arg6[%c0_12, %c0_13] : memref<128x128xf32, #tpu.memory_space<vmem>>, vector<128x128xf32>
    %c0_14 = arith.constant 0 : index
    %c0_15 = arith.constant 0 : index
    %16 = vector.load %arg7[%c0_14, %c0_15] : memref<1x128xf32, #tpu.memory_space<vmem>>, vector<1x128xf32>
    %cst_16 = arith.constant dense<0.000000e+00> : vector<8x128xf32>
    %17 = tpu.matmul %14, %15, %cst_16 {dimension_numbers = #tpu.dot_dimension_numbers<[1], [0], [0], [1], [0, 0, 1, 1], [], []>} : vector<8x128xf32>, vector<128x128xf32>, vector<8x128xf32> -> vector<8x128xf32>
    %18 = vector.broadcast %16 : vector<1x128xf32> to vector<8x128xf32>
    %19 = arith.addf %17, %18 : vector<8x128xf32>
    %c0_17 = arith.constant 0 : index
    %c0_18 = arith.constant 0 : index
    %20 = vector.load %arg8[%c0_17, %c0_18] : memref<8x128xf32, #tpu.memory_space<vmem>>, vector<8x128xf32>
    tpu.vector_store %arg8[%c0_17, %c0_18], %19 {strides = array<i32>} : memref<8x128xf32, #tpu.memory_space<vmem>>, vector<8x128xf32>,
    return
  }
  func.func @transform_0(%arg0: i32) -> (i32, i32) {
    %c0_i32 = arith.constant 0 : i32
    %c0_i32_0 = arith.constant 0 : i32
    return %arg0, %c0_i32 : i32, i32
  }
  func.func @transform_1(%arg0: i32) -> (i32, i32) {
    %c0_i32 = arith.constant 0 : i32
    %c0_i32_0 = arith.constant 0 : i32
    %c0_i32_1 = arith.constant 0 : i32
    return %c0_i32, %c0_i32_0 : i32, i32
  }
  func.func @transform_2(%arg0: i32) -> (i32, i32) {
    %c0_i32 = arith.constant 0 : i32
    %c0_i32_0 = arith.constant 0 : i32
    %c0_i32_1 = arith.constant 0 : i32
    return %c0_i32, %c0_i32_0 : i32, i32
  }
  func.func @transform_3(%arg0: i32) -> (i32, i32) {
    %c0_i32 = arith.constant 0 : i32
    %c0_i32_0 = arith.constant 0 : i32
    %c0_i32_1 = arith.constant 0 : i32
    return %c0_i32, %c0_i32_0 : i32, i32
  }
  func.func @transform_4(%arg0: i32) -> (i32, i32) {
    %c0_i32 = arith.constant 0 : i32
    %c0_i32_0 = arith.constant 0 : i32
    %c0_i32_1 = arith.constant 0 : i32
    return %c0_i32, %c0_i32_0 : i32, i32
  }
  func.func @transform_5(%arg0: i32) -> (i32, i32) {
    %c0_i32 = arith.constant 0 : i32
    %c0_i32_0 = arith.constant 0 : i32
    %c0_i32_1 = arith.constant 0 : i32
    return %c0_i32, %c0_i32_0 : i32, i32
  }
  func.func @transform_6(%arg0: i32) -> (i32, i32) {
    %c0_i32 = arith.constant 0 : i32
    %c0_i32_0 = arith.constant 0 : i32
    %c0_i32_1 = arith.constant 0 : i32
    return %c0_i32, %c0_i32_0 : i32, i32
  }
  func.func @transform_7(%arg0: i32) -> (i32, i32) {
    %c0_i32 = arith.constant 0 : i32
    %c0_i32_0 = arith.constant 0 : i32
    return %arg0, %c0_i32 : i32, i32
  }
}

</mosaic_0001>

<bundles_post_ra>
// kernel: _forward_impl.1
= control target key start
LH: loop header
LB: loop body
LE: loop exit
PB: predicated region body
PF: predicated region fallthrough
CT: control target
= control target key end

     0   :  { %12 = vsyncpa [#allocation3], 0  ;;  %s392_s0 = inlined_call_operand.hbm [shape: f32[8,32], index: 0, kind: input, shape index: {}]   ;;  %s393_s1 = inlined_call_operand.hbm [shape: f32[32,128], index: 1, kind: input, shape index: {}]   ;;  %s394_s2 = inlined_call_operand.vmem [shape: f32[1,128], index: 2, kind: input, shape index: {}]   ;;  %s395_s3 = inlined_call_operand.hbm [shape: f32[128,128], index: 3, kind: input, shape index: {}]   ;;  %s396_s4 = inlined_call_operand.vmem [shape: f32[1,128], index: 4, kind: input, shape index: {}]   ;;  %s397_s5 = inlined_call_operand.hbm [shape: f32[128,128], index: 5, kind: input, shape index: {}]   ;;  %s398_s6 = inlined_call_operand.vmem [shape: f32[1,128], index: 6, kind: input, shape index: {}]   ;;  %s399_s7 = inlined_call_operand.vmem [shape: f32[8,128], index: 7, kind: output, shape index: {}]  }
   0x1   :  { %13 = vsyncpa [#allocation5], 0  ;;  %s30_s26 = sshll.u32 %s393_s1, 4  ;;  %s31_s26 = int_to_ptr.hbm [resolvable:$true] %s30_s26 }
   0x2   :  { %14 = vsyncpa [#allocation8], 0  ;;  %s322_s27 = smov [#allocation4]   ;;  %s20_s8 = sshll.u32 %s392_s0, 4  ;;  %s21_s8 = int_to_ptr.hbm [resolvable:$true] %s20_s8 }
   0x3   :  { %s32_s28 = sshll.u32 %s322_s27, 4  ;;  %s323_s9 = smov 128   ;;  %s33_s28 = int_to_ptr.vmem [resolvable:$true] %s32_s28 }
   0x4   :  { %s324_s10 = smov 8   ;;  %s325_s11 = smov [#allocation2]  }
   0x5   :  { %38 = dma.hbm_to_vmem [thread:$0]  %s31_s26, 512, %s33_s28, [#allocation5], %s323_s9, %s323_s9, %s324_s10  }
   0x6   :  { %s22_s12 = sshll.u32 %s325_s11, 4  ;;  %s45_s15 = sshll.u32 %s395_s3, 4  ;;  %s23_s12 = int_to_ptr.vmem [resolvable:$true] %s22_s12  ;;  %s46_s15 = int_to_ptr.hbm [resolvable:$true] %s45_s15 }
   0x7   :  { %25 = dma.hbm_to_vmem [thread:$0]  %s21_s8, 128, %s23_s12, [#allocation3]  }
   0x8   :  { %s60_s17 = sshll.u32 %s397_s5, 4  ;;  %s326_s18 = smov [#allocation6]   ;;  %s61_s17 = int_to_ptr.hbm [resolvable:$true] %s60_s17 }
   0x9   :  { %s47_s19 = sshll.u32 %s326_s18, 4  ;;  %s327_s0 = smov [#allocation7]   ;;  %s48_s19 = int_to_ptr.vmem [resolvable:$true] %s47_s19 }
   0xa   :  { %53 = dma.hbm_to_vmem [thread:$0]  %s46_s15, 2048, %s48_s19, [#allocation5], %s323_s9, %s323_s9, %s324_s10  }
   0xb   :  { %s62_s20 = sshll.u32 %s327_s0, 4  ;;  %s63_s20 = int_to_ptr.vmem [resolvable:$true] %s62_s20 }
   0xc   :  { %68 = dma.hbm_to_vmem [thread:$0]  %s61_s17, 2048, %s63_s20, [#allocation8], %s323_s9, %s323_s9, %s324_s10  }
   0xd   :  { %316 = dma.done.wait [#allocation3], 128  }
   0xe   :  { %317 = vsyncadd [#allocation3], 4294967168 }
   0xf   :  { %318 = dma.done.wait [#allocation5], 2560  }
  0x10   :  { %319 = vsyncadd [#allocation5], 4294964736 }
  0x11   :  { %320 = dma.done.wait [#allocation8], 2048  }
  0x12   :  { %321 = vsyncadd [#allocation8], 4294965248  ;;  %v91_v0 = vld [vmem:[#allocation4 + $0x18] sm:$0xff]  ;;  %v90_v1 = vld [vmem:[#allocation4 + $0x10] sm:$0xff]  ;;  %vm96_vm0 = vcmask 261120  }
  0x13   :  { %112 = vmatpush.msra.mxu0 %v91_v0  ;;  %v136_v2 = vld [vmem:[#allocation6 + $0x78] sm:$0xff]  ;;  %v89_v3 = vld [vmem:[#allocation4 + $0x8] sm:$0xff]  ;;  %v135_v4 = vld [vmem:[#allocation6 + $0x70] sm:$0xff] }
  0x14   :  { %141 = vmatpush.msra.mxu1 %v136_v2  ;;  %v134_v5 = vld [vmem:[#allocation6 + $0x68] sm:$0xff]  ;;  %v88_v6 = vld [vmem:[#allocation4] sm:$0xff]  ;;  %v87_v7 = vld [vmem:[#allocation2] sm:$0xff] }
  0x15   :  { %113 = vmatpush.msra.mxu0 %v90_v1  ;;  %v133_v8 = vld [vmem:[#allocation6 + $0x60] sm:$0xff]  ;;  %v132_v9 = vld [vmem:[#allocation6 + $0x58] sm:$0xff]  ;;  %v131_v10 = vld [vmem:[#allocation6 + $0x50] sm:$0xff] }
  0x16   :  { %142 = vmatpush.msra.mxu1 %v135_v4  ;;  %v130_v11 = vld [vmem:[#allocation6 + $0x48] sm:$0xff]  ;;  %v129_v12 = vld [vmem:[#allocation6 + $0x40] sm:$0xff]  ;;  %v128_v13 = vld [vmem:[#allocation6 + $0x38] sm:$0xff] }
  0x17   :  { %114 = vmatpush.msra.mxu0 %v89_v3  ;;  %v127_v14 = vld [vmem:[#allocation6 + $0x30] sm:$0xff]  ;;  %v126_v15 = vld [vmem:[#allocation6 + $0x28] sm:$0xff]  ;;  %v125_v16 = vld [vmem:[#allocation6 + $0x20] sm:$0xff] }
  0x18   :  { %143 = vmatpush.msra.mxu1 %v134_v5  ;;  %v124_v17 = vld [vmem:[#allocation6 + $0x18] sm:$0xff]  ;;  %v123_v18 = vld [vmem:[#allocation6 + $0x10] sm:$0xff]  ;;  %v122_v19 = vld [vmem:[#allocation6 + $0x8] sm:$0xff] }
  0x19   :  { %115 = vmatpush.msra.mxu0 %v88_v6  ;;  %v121_v20 = vld [vmem:[#allocation6] sm:$0xff]  ;;  %v177_v21 = vld [vmem:[#allocation7 + $0x78] sm:$0xff]  ;;  %v176_v22 = vld [vmem:[#allocation7 + $0x70] sm:$0xff] }
  0x1a   :  { %210 = vmatmul.msk.f32.vlgmr.msra.gmra.mxu0 %vm96_vm0, %v87_v7  ;;  %144 = vmatpush.msra.mxu1 %v133_v8  ;;  %v175_v23 = vld [vmem:[#allocation7 + $0x68] sm:$0xff]  ;;  %v174_v24 = vld [vmem:[#allocation7 + $0x60] sm:$0xff]  ;;  %v173_v25 = vld [vmem:[#allocation7 + $0x58] sm:$0xff] }
  0x1b   :  { %182 = vmatpush.msra.mxu2 %v177_v21  ;;  %v172_v26 = vld [vmem:[#allocation7 + $0x50] sm:$0xff]  ;;  %v171_v27 = vld [vmem:[#allocation7 + $0x48] sm:$0xff]  ;;  %v170_v28 = vld [vmem:[#allocation7 + $0x40] sm:$0xff] }
  0x1c   :  { %145 = vmatpush.msra.mxu1 %v132_v9  ;;  %v169_v29 = vld [vmem:[#allocation7 + $0x38] sm:$0xff]  ;;  %v168_v30 = vld [vmem:[#allocation7 + $0x30] sm:$0xff]  ;;  %v167_v31 = vld [vmem:[#allocation7 + $0x28] sm:$0xff] }
  0x1d   :  { %183 = vmatpush.msra.mxu2 %v176_v22  ;;  %v166_v32 = vld [vmem:[#allocation7 + $0x20] sm:$0xff]  ;;  %v165_v33 = vld [vmem:[#allocation7 + $0x18] sm:$0xff]  ;;  %v164_v38 = vld [vmem:[#allocation7 + $0x10] sm:$0xff] }
  0x1e   :  { %146 = vmatpush.msra.mxu1 %v131_v10  ;;  %v217_v34 = vld [vmem:[%s394_s2] ss:$0 sm:$0xff]  ;;  %v163_v39 = vld [vmem:[#allocation7 + $0x8] sm:$0xff]  ;;  %v162_v40 = vld [vmem:[#allocation7] sm:$0xff] }
  0x1f   :  { %184 = vmatpush.msra.mxu2 %v175_v23  ;;  %v218_v41 = vld [vmem:[%s396_s4] ss:$0 sm:$0xff] }
  0x20   :  { %147 = vmatpush.msra.mxu1 %v130_v11  ;;  %v219_v45 = vld [vmem:[%s398_s6] ss:$0 sm:$0xff] }
  0x21   :  { %185 = vmatpush.msra.mxu2 %v174_v24 }
  0x22   :  { %148 = vmatpush.msra.mxu1 %v129_v12 }
  0x23   :  { %186 = vmatpush.msra.mxu2 %v173_v25 }
  0x24   :  { %149 = vmatpush.msra.mxu1 %v128_v13 }
  0x25   :  { %187 = vmatpush.msra.mxu2 %v172_v26 }
  0x26   :  { %150 = vmatpush.msra.mxu1 %v127_v14 }
  0x27   :  { %188 = vmatpush.msra.mxu2 %v171_v27 }
  0x28   :  { %151 = vmatpush.msra.mxu1 %v126_v15 }
  0x29   :  { %189 = vmatpush.msra.mxu2 %v170_v28 }
  0x2a   :  { %152 = vmatpush.msra.mxu1 %v125_v16 }
  0x2b   :  { %190 = vmatpush.msra.mxu2 %v169_v29 }
  0x2c   :  { %153 = vmatpush.msra.mxu1 %v124_v17 }
  0x2d   :  { %191 = vmatpush.msra.mxu2 %v168_v30 }
  0x2e   :  { %154 = vmatpush.msra.mxu1 %v123_v18 }
  0x2f   :  { %192 = vmatpush.msra.mxu2 %v167_v31 }
  0x30   :  { %155 = vmatpush.msra.mxu1 %v122_v19 }
  0x31   :  { %193 = vmatpush.msra.mxu2 %v166_v32 }
  0x32   :  { %156 = vmatpush.msra.mxu1 %v121_v20 }
  0x33   :  { %194 = vmatpush.msra.mxu2 %v165_v33 }
  0x35   :  { %195 = vmatpush.msra.mxu2 %v164_v38 }
  0x37   :  { %196 = vmatpush.msra.mxu2 %v163_v39 }
  0x39   :  { %197 = vmatpush.msra.mxu2 %v162_v40 }
  0x97   :  { %v117_v35 = vpop.f32.mrf.mxu0 }
  0x98   :  { %v118_v36 = vadd.f32 %v217_v34, %v117_v35 }
  0x9a   :  { %v120_v37 = vmax.f32 %v118_v36, 0.0 }
  0x9c   :  { %157 = vmatmul.f32.vlgmr.msra.gmra.mxu1 %v120_v37 }
 0x119   :  { %v158_v42 = vpop.f32.mrf.mxu1 }
 0x11a   :  { %v159_v43 = vadd.f32 %v218_v41, %v158_v42 }
 0x11c   :  { %v161_v44 = vmax.f32 %v159_v43, 0.0 }
 0x11e   :  { %198 = vmatmul.f32.vlgmr.msra.gmra.mxu2 %v161_v44 }
 0x1a1   :  { %v199_v46 = vpop.f32.mrf.mxu2 }
 0x1a2   :  { %v200_v47 = vadd.f32 %v219_v45, %v199_v46 }
 0x1a4   :  { %202 = vst [vmem:[%s399_s7] sm:$0xff] %v200_v47 }
 0x1a5   :  { %207 = vsyncpa [#allocation3], 1 }
 0x1a6   :  { %208 = vsyncpa [#allocation5], 1 }
 0x1a7   :  { %209 = vsyncpa [#allocation8], 1 }

</bundles_post_ra>
